<compile_context>
chip_gen: v7x
topology: tpu7x:2x2x1
jax: 0.10.0
libtpu: 0.0.40
codegen_flags: <defaults>
</compile_context>

<pallas_src>
import functools

import jax
import jax.numpy as jnp
from jax.experimental import pallas as pl
from jax.experimental.pallas import tpu as pltpu

_LANES = 128
_CHUNK_ROWS = 256  # inner compute chunk (rows); multiple of 32 => native
                   # sublane tile for f32 / bf16 / int8 blocks.


def _sublane_align(dtype):
    # native sublane count of an (x,128) tile: f32 -> 8, bf16 -> 16, int8 -> 32
    return max(8, 32 // jnp.dtype(dtype).itemsize)


def _focal_loss_kernel(x_ref, t_ref, out_ref, *, alpha, gamma, n_total,
                       tile_rows, chunk_rows, apply_mask):
    """One grid step: stream a (tile_rows, 128) block and accumulate an
    (8, 128) partial sum of the per-element focal loss.

    The DMA block is large (amortizes per-step pipeline overhead) while the
    element-wise chain runs over `chunk_rows`-row sub-chunks in a fori_loop so
    live f32 temporaries stay bounded independent of tile_rows.
    """
    blk = pl.program_id(0)
    n_chunks = tile_rows // chunk_rows
    g = float(gamma)
    int_gamma = g.is_integer() and 0 <= int(g) <= 8

    def chunk_body(ci, acc):
        start = pl.multiple_of(ci * chunk_rows, chunk_rows)
        x = x_ref[pl.ds(start, chunk_rows), :].astype(jnp.float32)
        tv = t_ref[pl.ds(start, chunk_rows), :]
        if tv.dtype == jnp.int8:
            t = tv.astype(jnp.int32).astype(jnp.float32)
        else:
            t = tv.astype(jnp.float32)

        # Fused sigmoid + numerically stable BCE-with-logits: one exp(-|x|)
        # feeds both; the sigmoid denominator uses the EUP approx reciprocal
        # (separate issue slot from the VPU).
        # TODO(synk): on v7x, if a bundle dump shows the EUP binding, move the
        # reciprocal to a VPU Newton step (3 EUP pushes/elem -> 2).
        e = jnp.exp(-jnp.abs(x))
        inv = pl.reciprocal(1.0 + e, approx=True)
        p = jnp.where(x >= 0, inv, e * inv)                   # sigmoid(x)
        bce = jnp.maximum(x, 0.0) - x * t + jnp.log1p(e)

        pt = p * t + (1.0 - p) * (1.0 - t)
        one_minus_pt = 1.0 - pt
        if int_gamma:
            # integer gamma -> repeated VPU multiplies (no exp/log pow)
            focal = jnp.ones_like(one_minus_pt)
            for _ in range(int(g)):
                focal = focal * one_minus_pt
        else:
            # approx reciprocal can push p an epsilon outside [0,1]; clamp so
            # the fractional power never sees a negative base (NaN).
            base = jnp.maximum(one_minus_pt, 0.0)
            focal = jnp.where(base > 0.0,
                              jnp.exp(g * jnp.log(jnp.maximum(base, 1e-38))),
                              0.0)

        loss = focal * bce
        if alpha >= 0:                                        # static branch
            alpha_t = alpha * t + (1.0 - alpha) * (1.0 - t)
            loss = alpha_t * loss

        if apply_mask:
            # Cheap ragged-tail mask: one (chunk,1) row compare + one (1,128)
            # lane compare instead of two full (chunk,128) int32 iotas.
            row0 = blk * tile_rows + ci * chunk_rows
            r = jax.lax.broadcasted_iota(jnp.int32, (chunk_rows, 1), 0) + row0
            c = jax.lax.broadcasted_iota(jnp.int32, (1, _LANES), 1)
            n_full_rows = n_total // _LANES
            rem = n_total % _LANES
            valid = (r < n_full_rows) | ((r == n_full_rows) & (c < rem))
            loss = jnp.where(valid, loss, 0.0)

        # (chunk,128) -> (8,128) with pure VPU adds (no per-chunk XLU reduce).
        return acc + loss.reshape(-1, 8, _LANES).sum(axis=0)

    acc = jax.lax.fori_loop(0, n_chunks, chunk_body,
                            jnp.zeros((8, _LANES), jnp.float32))
    out_ref[...] = acc


def focal_loss(inputs, targets, *, alpha=-1.0, gamma=2.0, tile_rows=4096,
               compact_targets="bf16"):
    """Pallas focal loss; returns a scalar (mean over all elements).

    compact_targets:
      "bf16" (default): stream {0,1} labels as bf16 (exact for hard labels).
      "int8":           stream labels as int8 (fewest HBM bytes; best where
                        the kernel is HBM-bound, i.e. v5e/v6e).
      None/False:       keep caller dtype (use for soft / label-smoothed
                        targets -- compaction would silently truncate them).
    bf16 logits are also accepted as-is (kernel upcasts to f32).
    """
    assert inputs.shape == targets.shape
    n_total = int(inputs.size)
    assert n_total > 0
    d = _LANES

    if compact_targets == "int8":
        t = targets.astype(jnp.int8)
    elif compact_targets in (True, "bf16"):
        t = targets.astype(jnp.bfloat16)
    else:
        t = targets

    n_rows = -(-n_total // d)  # cdiv
    if n_rows >= _CHUNK_ROWS:
        # Large path: big DMA blocks; a partial last grid block is handled by
        # the in-kernel mask (no padding of data to a multiple of tile_rows).
        tr = max(_CHUNK_ROWS,
                 (min(int(tile_rows), n_rows) // _CHUNK_ROWS) * _CHUNK_ROWS)
        chunk = _CHUNK_ROWS
        rows_out = n_rows
    else:
        # Small path (< 32K elements): one block, one chunk; round rows up to
        # the dtypes' native sublane tile (pad cost is negligible here).
        align = max(_sublane_align(inputs.dtype), _sublane_align(t.dtype))
        rows_out = ((n_rows + align - 1) // align) * align
        tr = rows_out
        chunk = tr

    num_blocks = -(-rows_out // tr)
    covered = num_blocks * tr * d
    apply_mask = covered != n_total

    total_padded = rows_out * d
    if total_padded == n_total:
        # Size already lane-aligned: reshape only, no extra HBM pass.
        x2 = inputs.reshape(rows_out, d)
        t2 = t.reshape(rows_out, d)
    else:
        pad = total_padded - n_total
        x2 = jnp.pad(inputs.reshape(-1), (0, pad)).reshape(rows_out, d)
        t2 = jnp.pad(t.reshape(-1), (0, pad)).reshape(rows_out, d)

    kernel = functools.partial(
        _focal_loss_kernel, alpha=float(alpha), gamma=float(gamma),
        n_total=n_total, tile_rows=tr, chunk_rows=chunk, apply_mask=apply_mask)

    bytes_in = x2.size * x2.dtype.itemsize + t2.size * t2.dtype.itemsize
    cost = pl.CostEstimate(flops=20 * covered, transcendentals=3 * covered,
                           bytes_accessed=bytes_in + num_blocks * 8 * d * 4)

    partials = pl.pallas_call(
        kernel,
        out_shape=jax.ShapeDtypeStruct((num_blocks, 8, d), jnp.float32),
        grid_spec=pltpu.PrefetchScalarGridSpec(
            num_scalar_prefetch=0,
            grid=(num_blocks,),
            in_specs=[pl.BlockSpec((tr, d), lambda i: (i, 0)),
                      pl.BlockSpec((tr, d), lambda i: (i, 0))],
            # Each grid step owns a disjoint (8,128) partial-sum block, so the
            # grid axis is safely "parallel" (shards across TCs on v7x).
            out_specs=pl.BlockSpec((None, 8, d), lambda i: (i, 0, 0)),
        ),
        compiler_params=pltpu.CompilerParams(
            dimension_semantics=("parallel",),
            # 2x double-buffered inputs (~6 MiB at tr=4096) + spilled chunk
            # temps stay well inside this on every generation (v5e scoped
            # default is 16 MiB, v7x physical VMEM is 64 MiB).
            vmem_limit_bytes=32 * 1024 * 1024,
        ),
        cost_estimate=cost,
    )(x2, t2)

    # Tiny final reduction + mean done by XLA outside the kernel.
    return jnp.sum(partials) / jnp.float32(n_total)


def focal_loss_ref(inputs, targets, *, alpha=-1.0, gamma=2.0):
    """Pure-JAX reference matching the PyTorch module exactly."""
    x = inputs.astype(jnp.float32)
    t = targets.astype(jnp.float32)
    p = jax.nn.sigmoid(x)
    bce = jnp.maximum(x, 0.0) - x * t + jnp.log1p(jnp.exp(-jnp.abs(x)))
    pt = p * t + (1.0 - p) * (1.0 - t)
    loss = (1.0 - pt) ** gamma * bce
    if alpha >= 0:
        alpha_t = alpha * t + (1.0 - alpha) * (1.0 - t)
        loss = alpha_t * loss
    return jnp.mean(loss)


if __name__ == "__main__":
    key = jax.random.PRNGKey(0)
    k1, k2, k3, k4, k5, k6 = jax.random.split(key, 6)

    # 1) Module-typical (batch, n_labels) logits with {0,1} labels.
    batch, n_labels = 16, 128
    x1 = jax.random.normal(k1, (batch, n_labels), dtype=jnp.float32)
    t1 = jax.random.bernoulli(k2, 0.3, (batch, n_labels)).astype(jnp.float32)
    out1 = jax.block_until_ready(focal_loss(x1, t1, alpha=-1.0, gamma=2.0))
    ref1 = focal_loss_ref(x1, t1, alpha=-1.0, gamma=2.0)
    assert jnp.allclose(out1, ref1, rtol=2e-3, atol=1e-5), (out1, ref1)

    # 2) Ragged size (not a multiple of 128) + alpha branch -> pad + mask path.
    x2 = jax.random.normal(k3, (6, 100), dtype=jnp.float32)
    t2 = jax.random.bernoulli(k4, 0.5, (6, 100)).astype(jnp.float32)
    out2 = jax.block_until_ready(focal_loss(x2, t2, alpha=0.25, gamma=2.0))
    ref2 = focal_loss_ref(x2, t2, alpha=0.25, gamma=2.0)
    assert jnp.allclose(out2, ref2, rtol=2e-3, atol=1e-5), (out2, ref2)

    # 3) Multi-block grid with a partial last block (no data padding at all)
    #    and int8-compacted labels.
    x3 = jax.random.normal(k5, (272, 128), dtype=jnp.float32)
    t3 = jax.random.bernoulli(k6, 0.3, (272, 128)).astype(jnp.float32)
    out3 = jax.block_until_ready(
        focal_loss(x3, t3, alpha=-1.0, gamma=2.0, tile_rows=256,
                   compact_targets="int8"))
    ref3 = focal_loss_ref(x3, t3, alpha=-1.0, gamma=2.0)
    assert jnp.allclose(out3, ref3, rtol=2e-3, atol=1e-5), (out3, ref3)

    print("KERNEL_OK")
</pallas_src>

<mosaic_0001>
module attributes {stable_mosaic.version = 11 : i64} {
  func.func @_focal_loss_kernel(%arg0: i32, %arg1: memref<16x128xf32, #tpu.memory_space<vmem>>, %arg2: memref<16x128xbf16, #tpu.memory_space<vmem>>, %arg3: memref<1x8x128xf32, #tpu.memory_space<vmem>>) attributes {dimension_semantics = [#tpu.dimension_semantics<parallel>], iteration_bounds = array<i64: 1>, scalar_prefetch = 0 : i64, scratch_operands = 0 : i64, tpu.core_type = #tpu.core_type<tc>, window_params = [{transform_indices = @transform_0, window_bounds = array<i64: 16, 128>}, {transform_indices = @transform_1, window_bounds = array<i64: 16, 128>}, {transform_indices = @transform_2, window_bounds = array<i64: 1, 8, 128>}]} {
    %cst = arith.constant 0.000000e+00 : f32
    %0 = vector.broadcast %cst : f32 to vector<8x128xf32>
    %c0_i32 = arith.constant 0 : i32
    %c16_i32 = arith.constant 16 : i32
    %1 = arith.muli %c0_i32, %c16_i32 : i32
    %2 = tpu.assume_multiple %1, 16 : i32
    %3 = arith.index_cast %2 : i32 to index
    %c0 = arith.constant 0 : index
    %4 = vector.load %arg1[%3, %c0] : memref<16x128xf32, #tpu.memory_space<vmem>>, vector<16x128xf32>
    %5 = arith.index_cast %2 : i32 to index
    %c0_0 = arith.constant 0 : index
    %6 = vector.load %arg2[%5, %c0_0] : memref<16x128xbf16, #tpu.memory_space<vmem>>, vector<16x128xbf16>
    %7 = arith.extf %6 : vector<16x128xbf16> to vector<16x128xf32>
    %8 = math.absf %4 : vector<16x128xf32>
    %cst_1 = arith.constant 0.000000e+00 : f32
    %9 = vector.broadcast %cst_1 : f32 to vector<16x128xf32>
    %10 = arith.subf %9, %8 : vector<16x128xf32>
    %11 = math.exp %10 : vector<16x128xf32>
    %cst_2 = arith.constant 1.000000e+00 : f32
    %12 = vector.broadcast %cst_2 : f32 to vector<16x128xf32>
    %13 = arith.addf %12, %11 : vector<16x128xf32>
    %14 = tpu.reciprocal %13 {approx = true} : vector<16x128xf32> -> vector<16x128xf32>
    %cst_3 = arith.constant 0.000000e+00 : f32
    %15 = vector.broadcast %cst_3 : f32 to vector<16x128xf32>
    %16 = arith.cmpf oge, %4, %15 : vector<16x128xf32>
    %17 = arith.mulf %11, %14 : vector<16x128xf32>
    %18 = arith.select %16, %14, %17 : vector<16x128xi1>, vector<16x128xf32>
    %cst_4 = arith.constant 0.000000e+00 : f32
    %19 = vector.broadcast %cst_4 : f32 to vector<16x128xf32>
    %20 = arith.maximumf %4, %19 : vector<16x128xf32>
    %21 = arith.mulf %4, %7 : vector<16x128xf32>
    %22 = arith.subf %20, %21 : vector<16x128xf32>
    %23 = math.log1p %11 : vector<16x128xf32>
    %24 = arith.addf %22, %23 : vector<16x128xf32>
    %25 = arith.mulf %18, %7 : vector<16x128xf32>
    %cst_5 = arith.constant 1.000000e+00 : f32
    %26 = vector.broadcast %cst_5 : f32 to vector<16x128xf32>
    %27 = arith.subf %26, %18 : vector<16x128xf32>
    %cst_6 = arith.constant 1.000000e+00 : f32
    %28 = vector.broadcast %cst_6 : f32 to vector<16x128xf32>
    %29 = arith.subf %28, %7 : vector<16x128xf32>
    %30 = arith.mulf %27, %29 : vector<16x128xf32>
    %31 = arith.addf %25, %30 : vector<16x128xf32>
    %cst_7 = arith.constant 1.000000e+00 : f32
    %32 = vector.broadcast %cst_7 : f32 to vector<16x128xf32>
    %33 = arith.subf %32, %31 : vector<16x128xf32>
    %cst_8 = arith.constant 1.000000e+00 : f32
    %34 = vector.broadcast %cst_8 : f32 to vector<16x128xf32>
    %35 = arith.mulf %34, %33 : vector<16x128xf32>
    %36 = arith.mulf %35, %33 : vector<16x128xf32>
    %37 = arith.mulf %36, %24 : vector<16x128xf32>
    %38 = vector.shape_cast %37 : vector<16x128xf32> to vector<2x8x128xf32>
    %cst_9 = arith.constant dense<0.000000e+00> : vector<8x128xf32>
    %39 = vector.multi_reduction <add>, %38, %cst_9 [0] : vector<2x8x128xf32> to vector<8x128xf32>
    %40 = arith.addf %0, %39 : vector<8x128xf32>
    %c1_i32 = arith.constant 1 : i32
    %c0_10 = arith.constant 0 : index
    %c0_11 = arith.constant 0 : index
    %c0_12 = arith.constant 0 : index
    %41 = vector.load %arg3[%c0_10, %c0_11, %c0_12] : memref<1x8x128xf32, #tpu.memory_space<vmem>>, vector<1x8x128xf32>
    %42 = vector.shape_cast %41 : vector<1x8x128xf32> to vector<8x128xf32>
    %43 = vector.shape_cast %40 : vector<8x128xf32> to vector<1x8x128xf32>
    tpu.vector_store %arg3[%c0_10, %c0_11, %c0_12], %43 {strides = array<i32>} : memref<1x8x128xf32, #tpu.memory_space<vmem>>, vector<1x8x128xf32>,
    return
  }
  func.func @transform_0(%arg0: i32) -> (i32, i32) {
    %c0_i32 = arith.constant 0 : i32
    %c0_i32_0 = arith.constant 0 : i32
    return %arg0, %c0_i32 : i32, i32
  }
  func.func @transform_1(%arg0: i32) -> (i32, i32) {
    %c0_i32 = arith.constant 0 : i32
    %c0_i32_0 = arith.constant 0 : i32
    return %arg0, %c0_i32 : i32, i32
  }
  func.func @transform_2(%arg0: i32) -> (i32, i32, i32) {
    %c0_i32 = arith.constant 0 : i32
    %c0_i32_0 = arith.constant 0 : i32
    %c0_i32_1 = arith.constant 0 : i32
    return %arg0, %c0_i32, %c0_i32_0 : i32, i32, i32
  }
}

</mosaic_0001>

<bundles_post_ra>
// kernel: tpu_custom_call.1
= control target key start
LH: loop header
LB: loop body
LE: loop exit
PB: predicated region body
PF: predicated region fallthrough
CT: control target
= control target key end

     0   :  { %7 = vsyncpa [#allocation3], 0  ;;  %s285_s0 = inlined_call_operand.hbm [shape: f32[16,128], index: 0, kind: input, shape index: {}]   ;;  %s286_s1 = inlined_call_operand.hbm [shape: bf16[16,128], index: 1, kind: input, shape index: {}]   ;;  %s287_s2 = inlined_call_operand.hbm [shape: f32[1,8,128], index: 2, kind: output, shape index: {}]  }
   0x1   :  { %8 = vsyncpa [#allocation6], 0 }
   0x2   :  { %9 = vsyncpa [#allocation4], 0  ;;  %s220_s9 = smov [#allocation2]   ;;  %s148_s13 = scalar_lea.hbm %s285_s0, 256 }
   0x3   :  { %s15_s10 = sshll.u32 %s220_s9, 4  ;;  %p149_p0 = scmp.ne.s32.totalorder %s285_s0, %s148_s13  ;;  %s16_s10 = int_to_ptr.vmem [resolvable:$true] %s15_s10 }
   0x4   :  { %p152_p1 = scmp.lt.u32.totalorder %s148_s13, %s285_s0 }
   0x6   :  { %p154_p2 = pnand %p152_p1, %p149_p0 }
   0x8   :  { %157 = shalt.err (!%p154_p2)
}
   0x9   :  { %s158_s18 = scalar_lea.vmem %s16_s10, 256  ;;  %p163_p4 = scmp.lt.s32.totalorder %s16_s10, %s16_s10 }
   0xa   :  { %p159_p3 = scmp.ne.s32.totalorder %s16_s10, %s158_s18  ;;  %p164_p5 = scmp.lt.s32.totalorder %s158_s18, %s158_s18 }
   0xc   :  { %p165_p6 = por %p164_p5, %p163_p4 }
   0xe   :  { %p166_p7 = pnand %p165_p6, %p159_p3 }
  0x10   :  { %169 = shalt.err (!%p166_p7)
}
  0x11   :  { %s221_s19 = smov 128   ;;  %s222_s20 = smov 8  }
  0x12   :  { %21 = dma.hbm_to_vmem [thread:$0]  %s285_s0, 256, %s16_s10, [#allocation3], %s221_s19, %s221_s19, %s222_s20  }
  0x13   :  { %s223_s23 = smov [#allocation5]   ;;  %s170_s27 = scalar_lea.hbm %s286_s1, 128 }
  0x14   :  { %s27_s24 = sshll.u32 %s223_s23, 4  ;;  %p171_p8 = scmp.ne.s32.totalorder %s286_s1, %s170_s27  ;;  %s28_s24 = int_to_ptr.vmem [resolvable:$true] %s27_s24 }
  0x15   :  { %p174_p9 = scmp.lt.u32.totalorder %s170_s27, %s286_s1 }
  0x17   :  { %p176_p10 = pnand %p174_p9, %p171_p8 }
  0x19   :  { %179 = shalt.err (!%p176_p10)
}
  0x1a   :  { %s180_s4 = scalar_lea.vmem %s28_s24, 128  ;;  %p185_p12 = scmp.lt.s32.totalorder %s28_s24, %s28_s24 }
  0x1b   :  { %p181_p11 = scmp.ne.s32.totalorder %s28_s24, %s180_s4  ;;  %p186_p13 = scmp.lt.s32.totalorder %s180_s4, %s180_s4 }
  0x1d   :  { %p187_p0 = por %p186_p13, %p185_p12 }
  0x1f   :  { %p188_p1 = pnand %p187_p0, %p181_p11 }
  0x21   :  { %191 = shalt.err (!%p188_p1)
}
  0x22   :  { %s224_s0 = smov 64   ;;  %s225_s5 = smov 4  }
  0x23   :  { %33 = dma.hbm_to_vmem [thread:$0]  %s286_s1, 128, %s28_s24, [#allocation6], %s224_s0, %s224_s0, %s225_s5  }
  0x24   :  { %214 = dma.done.wait [#allocation3], 256  }
  0x25   :  { %215 = vsyncadd [#allocation3], 4294967040 }
  0x26   :  { %216 = dma.done.wait [#allocation6], 128  }
  0x27   :  { %217 = vsyncadd [#allocation6], 4294967168  ;;  %v40_v0 = vld [vmem:[#allocation2] sm:$0xff]  ;;  %v41_v1 = vld [vmem:[#allocation2 + $0x8] sm:$0xff]  ;;  %s226_s1 = smov [#allocation7]  }
  0x28   :  { %v46_v2 = vand.u32 2147483647, %v40_v0  ;;  %v47_v3 = vand.u32 2147483647, %v41_v1  ;;  %v126_v12 = vld [vmem:[#allocation5] sm:$0xff]   ;;  %vm58_vm0 = vcmp.ge.f32.partialorder %v40_v0, 0.0 }
  0x29   :  { %v127_v15 = vunpack.c.l.bf16 %v126_v12  ;;  %v128_v16 = vunpack.c.h.bf16 %v126_v12  ;;  %vm59_vm1 = vcmp.ge.f32.partialorder %v41_v1, 0.0  ;;  %v64_v21 = vmax.f32 %v40_v0, 0.0  ;;  %s115_s8 = sshll.u32 %s226_s1, 4  ;;  %s116_s8 = int_to_ptr.vmem [resolvable:$true] %s115_s8 }
  0x2a   :  { %v48_v4 = vsub.f32 0.0, %v46_v2  ;;  %v49_v5 = vsub.f32 0.0, %v47_v3  ;;  %v65_v22 = vmax.f32 %v41_v1, 0.0  ;;  %s192_s9 = scalar_lea.vmem %s116_s8, 128  ;;  %p197_p3 = scmp.lt.s32.totalorder %s116_s8, %s116_s8 }
  0x2b   :  { %v66_v25 = vmul.f32 %v127_v15, %v40_v0  ;;  %v67_v26 = vmul.f32 %v128_v16, %v41_v1  ;;  %v94_v31 = vsub.f32 1.0, %v127_v15  ;;  %v95_v32 = vsub.f32 1.0, %v128_v16  ;;  %p193_p2 = scmp.ne.s32.totalorder %s116_s8, %s192_s9  ;;  %p198_p4 = scmp.lt.s32.totalorder %s192_s9, %s192_s9 }
  0x2c   :  { %v50_v6 = vmul.f32 1.442695, %v48_v4  ;;  %v52_v7 = vmul.f32 1.442695, %v49_v5 }
  0x2d   :  { %v68_v44 = vsub.f32 %v64_v21, %v66_v25  ;;  %v69_v46 = vsub.f32 %v65_v22, %v67_v26  ;;  %p199_p5 = por %p198_p4, %p197_p3 }
  0x2e   :  { %136 = vpow2.f32 %v50_v6 }
  0x2f   :  { %138 = vpow2.f32 %v52_v7  ;;  %p200_p6 = pnand %p199_p5, %p193_p2 }
  0x38   :  { %v137_v8 = vpop.eup %136 }
  0x39   :  { %v139_v9 = vpop.eup %138  ;;  %v54_v10 = vadd.f32 1.0, %v137_v8  ;;  %v73_v13 = vmul.f32 -0.5, %v137_v8  ;;  %v76_v17 = vand.u32 2147483647, %v137_v8 }
  0x3a   :  { %v55_v11 = vadd.f32 1.0, %v139_v9  ;;  %v82_v14 = vmul.f32 -0.5, %v139_v9  ;;  %v85_v27 = vand.u32 2147483647, %v139_v9 }
  0x3b   :  { %140 = vrcp.f32 %v54_v10  ;;  %v74_v18 = vadd.f32 1.0, %v73_v13  ;;  %vm266_vm2 = vcmp.lt.f32.partialorder %v76_v17, 0.0004427343 }
  0x3c   :  { %142 = vrcp.f32 %v55_v11  ;;  %v83_v19 = vadd.f32 1.0, %v82_v14  ;;  %vm86_vm3 = vcmp.lt.f32.partialorder %v85_v27, 0.0004427343 }
  0x3d   :  { %144 = vlog2.f32 %v54_v10  ;;  %v75_v36 = vmul.f32 %v137_v8, %v74_v18 }
  0x3e   :  { %146 = vlog2.f32 %v55_v11  ;;  %v84_v37 = vmul.f32 %v139_v9, %v83_v19 }
  0x45   :  { %v141_v20 = vpop.eup %140 }
  0x46   :  { %v143_v23 = vpop.eup %142  ;;  %v60_v24 = vmul.f32 %v141_v20, %v137_v8 }
  0x47   :  { %v145_v28 = vpop.eup %144  ;;  %v61_v29 = vmul.f32 %v143_v23, %v139_v9 }
  0x48   :  { %v147_v33 = vpop.eup %146  ;;  %v62_v34 = vsel %vm58_vm0, %v141_v20, %v60_v24  ;;  %v72_v35 = vmul.f32 0.6931472, %v145_v28 }
  0x49   :  { %v63_v38 = vsel %vm59_vm1, %v143_v23, %v61_v29  ;;  %v81_v39 = vmul.f32 0.6931472, %v147_v33  ;;  %v90_v40 = vmul.f32 %v127_v15, %v62_v34  ;;  %v92_v41 = vsub.f32 1.0, %v62_v34 }
  0x4a   :  { %v91_v42 = vmul.f32 %v128_v16, %v63_v38  ;;  %v93_v43 = vsub.f32 1.0, %v63_v38  ;;  %v78_v47 = vsel %vm266_vm2, %v75_v36, %v72_v35 }
  0x4b   :  { %v96_v45 = vmul.f32 %v94_v31, %v92_v41  ;;  %v87_v49 = vsel %vm86_vm3, %v84_v37, %v81_v39  ;;  %v88_v52 = vadd.f32 %v78_v47, %v68_v44 }
  0x4c   :  { %v97_v48 = vmul.f32 %v95_v32, %v93_v43  ;;  %v89_v54 = vadd.f32 %v87_v49, %v69_v46 }
  0x4d   :  { %v98_v50 = vadd.f32 %v96_v45, %v90_v40 }
  0x4e   :  { %v99_v51 = vadd.f32 %v97_v48, %v91_v42 }
  0x4f   :  { %v100_v53 = vsub.f32 1.0, %v98_v50 }
  0x50   :  { %v101_v55 = vsub.f32 1.0, %v99_v51 }
  0x51   :  { %v102_v56 = vmul.f32 %v100_v53, %v100_v53 }
  0x52   :  { %v103_v57 = vmul.f32 %v101_v55, %v101_v55 }
  0x53   :  { %v104_v58 = vmul.f32 %v102_v56, %v88_v52 }
  0x54   :  { %v105_v59 = vmul.f32 %v103_v57, %v89_v54 }
  0x56   :  { %v106_v60 = vadd.f32 %v105_v59, %v104_v58 }
  0x58   :  { %108 = vst [vmem:[#allocation7] sm:$0xff] %v106_v60 }
  0x59   :  { %203 = shalt.err (!%p200_p6)
}
  0x5a   :  { %s204_s12 = scalar_lea.hbm %s287_s2, 128 }
  0x5b   :  { %p205_p7 = scmp.ne.s32.totalorder %s287_s2, %s204_s12  ;;  %p208_p8 = scmp.lt.u32.totalorder %s204_s12, %s287_s2 }
  0x5d   :  { %p210_p9 = pnand %p208_p8, %p205_p7 }
  0x5f   :  { %213 = shalt.err (!%p210_p9)
}
  0x60   :  { %118 = dma.vmem_to_hbm [thread:$0]  %s116_s8, 128, %s287_s2, [#allocation4]  }
  0x61   :  { %218 = dma.done.wait [#allocation4], 128  }
  0x62   :  { %219 = vsyncadd [#allocation4], 4294967168 }
  0x63   :  { %122 = vsyncpa [#allocation3], 1 }
  0x64   :  { %123 = vsyncpa [#allocation6], 1 }
  0x65   :  { %124 = vsyncpa [#allocation4], 1 }

</bundles_post_ra>
